<compile_context>
chip_gen: v7x
topology: tpu7x:2x2x1
jax: 0.10.0
libtpu: 0.0.40
codegen_flags: <defaults>
</compile_context>

<pallas_src>
import functools

import jax
import jax.numpy as jnp
from jax.experimental import pallas as pl
from jax.experimental.pallas import tpu as pltpu

IN_DIM = 28 * 28      # 784 (multiple of 16 -> clean bf16 sublane packing, no K pad)
H1 = 256
H2 = 64
H2_PAD = 128          # 64 -> 128 (padded once; never touches HBM per-row)
OUT = 10              # logits written directly, lane-masked store (tiny bytes)

DEFAULT_TB = 1024     # batch tile; amortizes per-grid-step overhead to <~10%


def _round_up(n: int, m: int) -> int:
    return pl.cdiv(n, m) * m


def mlp_kernel(x_ref, w1_ref, b1_ref, w2_ref, b2_ref, w3_ref, b3_ref, o_ref):
    # Cast x f32 -> bf16 in-kernel (cheap VPU op, hidden under DMA/MXU).
    xb = x_ref[...].astype(jnp.bfloat16)
    # fc1 + ReLU   (bf16 x bf16 -> f32 accumulate on the MXU)
    h1 = jnp.dot(xb, w1_ref[...], preferred_element_type=jnp.float32)
    h1 = jnp.maximum(h1 + b1_ref[...], 0.0).astype(jnp.bfloat16)
    # fc2 + ReLU   (N padded 64->128; padded cols stay exactly zero)
    h2 = jnp.dot(h1, w2_ref[...], preferred_element_type=jnp.float32)
    h2 = jnp.maximum(h2 + b2_ref[...], 0.0).astype(jnp.bfloat16)
    # fc3 (logits, no activation)
    out = jnp.dot(h2, w3_ref[...], preferred_element_type=jnp.float32)
    o_ref[...] = (out + b3_ref[...]).astype(o_ref.dtype)


def prepare_params(params):
    """Pad H2 to lane width and cast weights to bf16 (done once, offline)."""
    w1, b1, w2, b2, w3, b3 = params
    w1p = w1.astype(jnp.bfloat16)                                        # (784, 256)
    w2p = jnp.pad(w2, ((0, 0), (0, H2_PAD - H2))).astype(jnp.bfloat16)   # (256, 128)
    w3p = jnp.pad(w3, ((0, H2_PAD - H2), (0, 0))).astype(jnp.bfloat16)   # (128, 10)
    b1p = b1.astype(jnp.float32)                                         # (1, 256)
    b2p = jnp.pad(b2, ((0, 0), (0, H2_PAD - H2))).astype(jnp.float32)    # (1, 128)
    b3p = b3.astype(jnp.float32)                                         # (1, 10)
    return (w1p, b1p, w2p, b2p, w3p, b3p)


@functools.partial(jax.jit, static_argnames=("tb",))
def net_forward(x, prepared_params, *, tb: int = DEFAULT_TB):
    """Forward pass. x: (B, 784) f32.  Returns (B, 10) f32 logits."""
    w1p, b1p, w2p, b2p, w3p, b3p = prepared_params
    B = x.shape[0]

    # Adaptive batch tiling: minimal padding for awkward B, and >= 2 grid steps
    # for decently sized batches so the batch axis can shard across TCs (v7x).
    n_tiles = pl.cdiv(B, tb)
    if n_tiles == 1 and B >= 256:
        n_tiles = 2
    TB = _round_up(pl.cdiv(B, n_tiles), 16)
    B_pad = n_tiles * TB

    if B_pad != B:
        x = jnp.pad(x, ((0, B_pad - B), (0, 0)))   # batch-only pad; rows independent

    grid = (n_tiles,)
    # Batch-tiled x/out (double-buffered DMA); weights & biases VMEM-resident
    # across grid steps via constant block index_maps.
    in_specs = [
        pl.BlockSpec((TB, IN_DIM), lambda i: (i, 0)),        # x tile (f32, full width)
        pl.BlockSpec((IN_DIM, H1), lambda i: (0, 0)),        # w1
        pl.BlockSpec((1, H1), lambda i: (0, 0)),             # b1
        pl.BlockSpec((H1, H2_PAD), lambda i: (0, 0)),        # w2
        pl.BlockSpec((1, H2_PAD), lambda i: (0, 0)),         # b2
        pl.BlockSpec((H2_PAD, OUT), lambda i: (0, 0)),       # w3
        pl.BlockSpec((1, OUT), lambda i: (0, 0)),            # b3
    ]
    out_specs = pl.BlockSpec((TB, OUT), lambda i: (i, 0))

    weight_bytes = 2 * (IN_DIM * H1 + H1 * H2_PAD + H2_PAD * OUT)
    bias_bytes = 4 * (H1 + H2_PAD + OUT)
    cost = pl.CostEstimate(
        flops=2 * B_pad * (IN_DIM * H1 + H1 * H2_PAD + H2_PAD * OUT),
        bytes_accessed=(x.dtype.itemsize * B_pad * IN_DIM
                        + 4 * B_pad * OUT + weight_bytes + bias_bytes),
        transcendentals=0,
    )

    out = pl.pallas_call(
        mlp_kernel,
        out_shape=jax.ShapeDtypeStruct((B_pad, OUT), jnp.float32),
        grid_spec=pltpu.PrefetchScalarGridSpec(
            num_scalar_prefetch=0,
            grid=grid,
            in_specs=in_specs,
            out_specs=out_specs,
        ),
        compiler_params=pltpu.CompilerParams(
            dimension_semantics=("parallel",),       # batch tiles are independent
            vmem_limit_bytes=48 * 1024 * 1024,       # explicit (v5e default is 16 MiB)
        ),
        cost_estimate=cost,
    )(x, w1p, b1p, w2p, b2p, w3p, b3p)

    return out if B_pad == B else out[:B]


def init_params(key):
    """Deterministic init mimicking nn.Linear defaults (uniform +/- 1/sqrt(fan_in))."""
    ks = jax.random.split(key, 6)

    def linear(kw, kb, fan_in, fan_out):
        bound = 1.0 / jnp.sqrt(fan_in)
        w = jax.random.uniform(kw, (fan_in, fan_out), jnp.float32, -bound, bound)
        b = jax.random.uniform(kb, (1, fan_out), jnp.float32, -bound, bound)
        return w, b

    w1, b1 = linear(ks[0], ks[1], IN_DIM, H1)
    w2, b2 = linear(ks[2], ks[3], H1, H2)
    w3, b3 = linear(ks[4], ks[5], H2, OUT)
    return (w1, b1, w2, b2, w3, b3)


def _reference_bf16(x, params):
    """Same math as the kernel (bf16 operands, f32 accumulation), pure JAX."""
    w1, b1, w2, b2, w3, b3 = params
    xb = x.astype(jnp.bfloat16)
    h1 = jnp.maximum(
        jnp.dot(xb, w1.astype(jnp.bfloat16), preferred_element_type=jnp.float32) + b1, 0.0
    ).astype(jnp.bfloat16)
    h2 = jnp.maximum(
        jnp.dot(h1, w2.astype(jnp.bfloat16), preferred_element_type=jnp.float32) + b2, 0.0
    ).astype(jnp.bfloat16)
    return jnp.dot(h2, w3.astype(jnp.bfloat16), preferred_element_type=jnp.float32) + b3


def _reference_f32(x, params):
    w1, b1, w2, b2, w3, b3 = params
    h1 = jnp.maximum(x @ w1 + b1, 0.0)
    h2 = jnp.maximum(h1 @ w2 + b2, 0.0)
    return h2 @ w3 + b3


if __name__ == "__main__":
    key = jax.random.PRNGKey(0)
    k_x, k_p, k_x2 = jax.random.split(key, 3)
    params = init_params(k_p)
    prepared = prepare_params(params)

    # Small latency-style batch (single tile, padded 8 -> 16 rows internally).
    B = 8
    x = jax.random.normal(k_x, (B, IN_DIM), jnp.float32)
    out = net_forward(x, prepared)
    jax.block_until_ready(out)
    assert out.shape == (B, OUT)
    assert jnp.allclose(out, _reference_bf16(x, params), atol=2e-3, rtol=2e-3)
    assert jnp.allclose(out, _reference_f32(x, params), atol=5e-2, rtol=5e-2)

    # Multi-tile grid path (grid=(3,), no padding, no output slice).
    B2 = 48
    x2 = jax.random.normal(k_x2, (B2, IN_DIM), jnp.float32)
    out2 = net_forward(x2, prepared, tb=16)
    jax.block_until_ready(out2)
    assert out2.shape == (B2, OUT)
    assert jnp.allclose(out2, _reference_bf16(x2, params), atol=2e-3, rtol=2e-3)

    print("KERNEL_OK")
</pallas_src>

<mosaic_0001>
module attributes {stable_mosaic.version = 11 : i64} {
  func.func @mlp_kernel(%arg0: i32, %arg1: memref<16x784xf32, #tpu.memory_space<vmem>>, %arg2: memref<784x256xbf16, #tpu.memory_space<vmem>>, %arg3: memref<1x256xf32, #tpu.memory_space<vmem>>, %arg4: memref<256x128xbf16, #tpu.memory_space<vmem>>, %arg5: memref<1x128xf32, #tpu.memory_space<vmem>>, %arg6: memref<128x10xbf16, #tpu.memory_space<vmem>>, %arg7: memref<1x10xf32, #tpu.memory_space<vmem>>, %arg8: memref<16x10xf32, #tpu.memory_space<vmem>>) attributes {dimension_semantics = [#tpu.dimension_semantics<parallel>], iteration_bounds = array<i64: 1>, scalar_prefetch = 0 : i64, scratch_operands = 0 : i64, tpu.core_type = #tpu.core_type<tc>, window_params = [{transform_indices = @transform_0, window_bounds = array<i64: 16, 784>}, {pipeline_mode = #tpu.pipeline_mode<synchronous>, transform_indices = @transform_1, window_bounds = array<i64: 784, 256>}, {pipeline_mode = #tpu.pipeline_mode<synchronous>, transform_indices = @transform_2, window_bounds = array<i64: 1, 256>}, {pipeline_mode = #tpu.pipeline_mode<synchronous>, transform_indices = @transform_3, window_bounds = array<i64: 256, 128>}, {pipeline_mode = #tpu.pipeline_mode<synchronous>, transform_indices = @transform_4, window_bounds = array<i64: 1, 128>}, {pipeline_mode = #tpu.pipeline_mode<synchronous>, transform_indices = @transform_5, window_bounds = array<i64: 128, 10>}, {pipeline_mode = #tpu.pipeline_mode<synchronous>, transform_indices = @transform_6, window_bounds = array<i64: 1, 10>}, {transform_indices = @transform_7, window_bounds = array<i64: 16, 10>}]} {
    %c0 = arith.constant 0 : index
    %c0_0 = arith.constant 0 : index
    %0 = vector.load %arg1[%c0, %c0_0] : memref<16x784xf32, #tpu.memory_space<vmem>>, vector<16x784xf32>
    %1 = arith.truncf %0 : vector<16x784xf32> to vector<16x784xbf16>
    %c0_1 = arith.constant 0 : index
    %c0_2 = arith.constant 0 : index
    %2 = vector.load %arg2[%c0_1, %c0_2] : memref<784x256xbf16, #tpu.memory_space<vmem>>, vector<784x256xbf16>
    %cst = arith.constant dense<0.000000e+00> : vector<16x256xf32>
    %3 = tpu.matmul %1, %2, %cst {dimension_numbers = #tpu.dot_dimension_numbers<[1], [0], [0], [1], [0, 0, 1, 1], [], []>} : vector<16x784xbf16>, vector<784x256xbf16>, vector<16x256xf32> -> vector<16x256xf32>
    %c0_3 = arith.constant 0 : index
    %c0_4 = arith.constant 0 : index
    %4 = vector.load %arg3[%c0_3, %c0_4] : memref<1x256xf32, #tpu.memory_space<vmem>>, vector<1x256xf32>
    %5 = vector.broadcast %4 : vector<1x256xf32> to vector<16x256xf32>
    %6 = arith.addf %3, %5 : vector<16x256xf32>
    %cst_5 = arith.constant 0.000000e+00 : f32
    %7 = vector.broadcast %cst_5 : f32 to vector<16x256xf32>
    %8 = arith.maximumf %6, %7 : vector<16x256xf32>
    %9 = arith.truncf %8 : vector<16x256xf32> to vector<16x256xbf16>
    %c0_6 = arith.constant 0 : index
    %c0_7 = arith.constant 0 : index
    %10 = vector.load %arg4[%c0_6, %c0_7] : memref<256x128xbf16, #tpu.memory_space<vmem>>, vector<256x128xbf16>
    %cst_8 = arith.constant dense<0.000000e+00> : vector<16x128xf32>
    %11 = tpu.matmul %9, %10, %cst_8 {dimension_numbers = #tpu.dot_dimension_numbers<[1], [0], [0], [1], [0, 0, 1, 1], [], []>} : vector<16x256xbf16>, vector<256x128xbf16>, vector<16x128xf32> -> vector<16x128xf32>
    %c0_9 = arith.constant 0 : index
    %c0_10 = arith.constant 0 : index
    %12 = vector.load %arg5[%c0_9, %c0_10] : memref<1x128xf32, #tpu.memory_space<vmem>>, vector<1x128xf32>
    %13 = vector.broadcast %12 : vector<1x128xf32> to vector<16x128xf32>
    %14 = arith.addf %11, %13 : vector<16x128xf32>
    %cst_11 = arith.constant 0.000000e+00 : f32
    %15 = vector.broadcast %cst_11 : f32 to vector<16x128xf32>
    %16 = arith.maximumf %14, %15 : vector<16x128xf32>
    %17 = arith.truncf %16 : vector<16x128xf32> to vector<16x128xbf16>
    %c0_12 = arith.constant 0 : index
    %c0_13 = arith.constant 0 : index
    %18 = vector.load %arg6[%c0_12, %c0_13] : memref<128x10xbf16, #tpu.memory_space<vmem>>, vector<128x10xbf16>
    %cst_14 = arith.constant dense<0.000000e+00> : vector<16x10xf32>
    %19 = tpu.matmul %17, %18, %cst_14 {dimension_numbers = #tpu.dot_dimension_numbers<[1], [0], [0], [1], [0, 0, 1, 1], [], []>} : vector<16x128xbf16>, vector<128x10xbf16>, vector<16x10xf32> -> vector<16x10xf32>
    %c0_15 = arith.constant 0 : index
    %c0_16 = arith.constant 0 : index
    %20 = vector.load %arg7[%c0_15, %c0_16] : memref<1x10xf32, #tpu.memory_space<vmem>>, vector<1x10xf32>
    %21 = vector.broadcast %20 : vector<1x10xf32> to vector<16x10xf32>
    %22 = arith.addf %19, %21 : vector<16x10xf32>
    %c0_17 = arith.constant 0 : index
    %c0_18 = arith.constant 0 : index
    %23 = vector.load %arg8[%c0_17, %c0_18] : memref<16x10xf32, #tpu.memory_space<vmem>>, vector<16x10xf32>
    tpu.vector_store %arg8[%c0_17, %c0_18], %22 {strides = array<i32>} : memref<16x10xf32, #tpu.memory_space<vmem>>, vector<16x10xf32>,
    return
  }
  func.func @transform_0(%arg0: i32) -> (i32, i32) {
    %c0_i32 = arith.constant 0 : i32
    %c0_i32_0 = arith.constant 0 : i32
    return %arg0, %c0_i32 : i32, i32
  }
  func.func @transform_1(%arg0: i32) -> (i32, i32) {
    %c0_i32 = arith.constant 0 : i32
    %c0_i32_0 = arith.constant 0 : i32
    %c0_i32_1 = arith.constant 0 : i32
    return %c0_i32, %c0_i32_0 : i32, i32
  }
  func.func @transform_2(%arg0: i32) -> (i32, i32) {
    %c0_i32 = arith.constant 0 : i32
    %c0_i32_0 = arith.constant 0 : i32
    %c0_i32_1 = arith.constant 0 : i32
    return %c0_i32, %c0_i32_0 : i32, i32
  }
  func.func @transform_3(%arg0: i32) -> (i32, i32) {
    %c0_i32 = arith.constant 0 : i32
    %c0_i32_0 = arith.constant 0 : i32
    %c0_i32_1 = arith.constant 0 : i32
    return %c0_i32, %c0_i32_0 : i32, i32
  }
  func.func @transform_4(%arg0: i32) -> (i32, i32) {
    %c0_i32 = arith.constant 0 : i32
    %c0_i32_0 = arith.constant 0 : i32
    %c0_i32_1 = arith.constant 0 : i32
    return %c0_i32, %c0_i32_0 : i32, i32
  }
  func.func @transform_5(%arg0: i32) -> (i32, i32) {
    %c0_i32 = arith.constant 0 : i32
    %c0_i32_0 = arith.constant 0 : i32
    %c0_i32_1 = arith.constant 0 : i32
    return %c0_i32, %c0_i32_0 : i32, i32
  }
  func.func @transform_6(%arg0: i32) -> (i32, i32) {
    %c0_i32 = arith.constant 0 : i32
    %c0_i32_0 = arith.constant 0 : i32
    %c0_i32_1 = arith.constant 0 : i32
    return %c0_i32, %c0_i32_0 : i32, i32
  }
  func.func @transform_7(%arg0: i32) -> (i32, i32) {
    %c0_i32 = arith.constant 0 : i32
    %c0_i32_0 = arith.constant 0 : i32
    return %arg0, %c0_i32 : i32, i32
  }
}

</mosaic_0001>

<bundles_post_ra>
// kernel: net_forward.1
= control target key start
LH: loop header
LB: loop body
LE: loop exit
PB: predicated region body
PF: predicated region fallthrough
CT: control target
= control target key end

     0   :  { %12 = vsyncpa [#allocation3], 0  ;;  %s1536_s24 = smov [#allocation2]   ;;  %s1723_s0 = inlined_call_operand.vmem [shape: f32[16,784], index: 0, kind: input, shape index: {}]   ;;  %s1724_s1 = inlined_call_operand.hbm [shape: bf16[784,256], index: 1, kind: input, shape index: {}]   ;;  %s1725_s2 = inlined_call_operand.vmem [shape: f32[1,256], index: 2, kind: input, shape index: {}]   ;;  %s1726_s3 = inlined_call_operand.vmem [shape: bf16[256,128], index: 3, kind: input, shape index: {}]   ;;  %s1727_s4 = inlined_call_operand.vmem [shape: f32[1,128], index: 4, kind: input, shape index: {}]   ;;  %s1728_s5 = inlined_call_operand.vmem [shape: bf16[128,10], index: 5, kind: input, shape index: {}]   ;;  %s1729_s6 = inlined_call_operand.vmem [shape: f32[1,10], index: 6, kind: input, shape index: {}]   ;;  %s1730_s7 = inlined_call_operand.vmem [shape: f32[16,10], index: 7, kind: output, shape index: {}]  }
   0x1   :  { %s20_s25 = sshll.u32 %s1536_s24, 4  ;;  %s1512_s28 = scalar_lea.hbm %s1724_s1, 12544  ;;  %s21_s25 = int_to_ptr.vmem [resolvable:$true] %s20_s25 }
   0x2   :  { %p1513_p0 = scmp.ne.s32.totalorder %s1724_s1, %s1512_s28  ;;  %p1516_p1 = scmp.lt.u32.totalorder %s1512_s28, %s1724_s1 }
   0x4   :  { %p1518_p2 = pnand %p1516_p1, %p1513_p0 }
   0x6   :  { %1521 = shalt.err (!%p1518_p2)
}
   0x7   :  { %s1522_s10 = scalar_lea.vmem %s21_s25, 12544  ;;  %p1527_p4 = scmp.lt.s32.totalorder %s21_s25, %s21_s25 }
   0x8   :  { %p1523_p3 = scmp.ne.s32.totalorder %s21_s25, %s1522_s10  ;;  %p1528_p5 = scmp.lt.s32.totalorder %s1522_s10, %s1522_s10 }
   0xa   :  { %p1529_p6 = por %p1528_p5, %p1527_p4 }
   0xc   :  { %p1530_p7 = pnand %p1529_p6, %p1523_p3 }
   0xe   :  { %1533 = shalt.err (!%p1530_p7)
}
   0xf   :  { %s1537_s11 = smov 128   ;;  %s1538_s12 = smov 8  }
  0x10   :  { %26 = dma.hbm_to_vmem [thread:$0]  %s1724_s1, 12544, %s21_s25, [#allocation3], %s1537_s11, %s1537_s11, %s1538_s12  }
  0x11   :  { %1534 = dma.done.wait [#allocation3], 12544  }
  0x12   :  { %1535 = vsyncadd [#allocation3], 4294954752  ;;  %v1341_v0 = vld [vmem:[#allocation2 + $0x104] ss:$8 sps:$4 sm:$0xff]   ;;  %v1343_v1 = vld [vmem:[#allocation2 + $0x100] ss:$8 sps:$4 sm:$0xff]  }
  0x13   :  { %709 = vmatprep.subr.bf16.mxu0 %v1341_v0  ;;  %v1344_v2 = vld [vmem:[#allocation2 + $0x114] ss:$8 sps:$4 sm:$0xff]   ;;  %v1346_v3 = vld [vmem:[#allocation2 + $0x110] ss:$8 sps:$4 sm:$0xff]   ;;  %v1347_v4 = vld [vmem:[#allocation2 + $0x124] ss:$8 sps:$4 sm:$0xff]  }
  0x14   :  { %710 = vmatpush1.bf16.msra.mxu0 %v1343_v1  ;;  %v1349_v5 = vld [vmem:[#allocation2 + $0x120] ss:$8 sps:$4 sm:$0xff]   ;;  %v1350_v6 = vld [vmem:[#allocation2 + $0x134] ss:$8 sps:$4 sm:$0xff]   ;;  %v1352_v7 = vld [vmem:[#allocation2 + $0x130] ss:$8 sps:$4 sm:$0xff]  }
  0x15   :  { %711 = vmatprep.subr.bf16.mxu0 %v1344_v2  ;;  %v1353_v8 = vld [vmem:[#allocation2 + $0x144] ss:$8 sps:$4 sm:$0xff]   ;;  %v1355_v9 = vld [vmem:[#allocation2 + $0x140] ss:$8 sps:$4 sm:$0xff]   ;;  %v1356_v10 = vld [vmem:[#allocation2 + $0x154] ss:$8 sps:$4 sm:$0xff]  }
  0x16   :  { %v1358_v11 = vld [vmem:[#allocation2 + $0x150] ss:$8 sps:$4 sm:$0xff]   ;;  %v1359_v12 = vld [vmem:[#allocation2 + $0x164] ss:$8 sps:$4 sm:$0xff]   ;;  %v1361_v16 = vld [vmem:[#allocation2 + $0x160] ss:$8 sps:$4 sm:$0xff]  }
  0x17   :  { %v44_v13 = vld [vmem:[%s1723_s0 + $0x18] sm:$0xff]  ;;  %v51_v14 = vld [vmem:[%s1723_s0 + $0x50] sm:$0xff]  ;;  %v1395_v18 = vld [vmem:[#allocation2 + $0x4] ss:$8 sps:$4 sm:$0xff]   ;;  %vm662_vm0 = vcmask 130048   ;;  %vm1541_vm1 = vmmov 0  }
  0x18   :  { %712 = vmatpush1.bf16.msra.mxu0 %v1346_v3  ;;  %v58_v15 = vpack.c.bf16 %v51_v14, %v44_v13  ;;  %v1362_v17 = vld [vmem:[#allocation2 + $0x174] ss:$8 sps:$4 sm:$0xff]   ;;  %v1364_v19 = vld [vmem:[#allocation2 + $0x170] ss:$8 sps:$4 sm:$0xff]   ;;  %v1365_v20 = vld [vmem:[#allocation2 + $0x184] ss:$8 sps:$4 sm:$0xff]   ;;  %666 = vmatprep.subr.bf16.mxu1 %v1395_v18 }
  0x19   :  { %713 = vmatprep.subr.bf16.mxu0 %v1347_v4  ;;  %v1400_v21 = vld [vmem:[#allocation2] ss:$8 sps:$4 sm:$0xff]   ;;  %v1401_v22 = vld [vmem:[#allocation2 + $0x14] ss:$8 sps:$4 sm:$0xff]   ;;  %v1406_v24 = vld [vmem:[#allocation2 + $0x10] ss:$8 sps:$4 sm:$0xff]  }
  0x1a   :  { %741 = vmatprep.mubr.bf16.mxu0 %v58_v15  ;;  %667 = vmatpush1.bf16.msra.mxu1 %v1400_v21  ;;  %v1367_v23 = vld [vmem:[#allocation2 + $0x180] ss:$8 sps:$4 sm:$0xff]   ;;  %v1407_v25 = vld [vmem:[#allocation2 + $0x24] ss:$8 sps:$4 sm:$0xff]   ;;  %v1368_v26 = vld [vmem:[#allocation2 + $0x194] ss:$8 sps:$4 sm:$0xff]  }
  0x1b   :  { %668 = vmatprep.subr.bf16.mxu1 %v1401_v22  ;;  %v1412_v27 = vld [vmem:[#allocation2 + $0x20] ss:$8 sps:$4 sm:$0xff]   ;;  %v1413_v28 = vld [vmem:[#allocation2 + $0x34] ss:$8 sps:$4 sm:$0xff]   ;;  %v1370_v29 = vld [vmem:[#allocation2 + $0x190] ss:$8 sps:$4 sm:$0xff]  }
  0x1c   :  { %714 = vmatpush1.bf16.msra.mxu0 %v1349_v5  ;;  %v1371_v30 = vld [vmem:[#allocation2 + $0x1a4] ss:$8 sps:$4 sm:$0xff]   ;;  %v1418_v31 = vld [vmem:[#allocation2 + $0x30] ss:$8 sps:$4 sm:$0xff]   ;;  %v1373_v33 = vld [vmem:[#allocation2 + $0x1a0] ss:$8 sps:$4 sm:$0xff]  }
  0x1d   :  { %715 = vmatprep.subr.bf16.mxu0 %v1350_v6  ;;  %v1419_v32 = vld [vmem:[#allocation2 + $0x44] ss:$8 sps:$4 sm:$0xff]   ;;  %v1374_v34 = vld [vmem:[#allocation2 + $0x1b4] ss:$8 sps:$4 sm:$0xff]   ;;  %v1424_v35 = vld [vmem:[#allocation2 + $0x40] ss:$8 sps:$4 sm:$0xff]  }
  0x1e   :  { %669 = vmatpush1.bf16.msra.mxu1 %v1406_v24  ;;  %v1425_v36 = vld [vmem:[#allocation2 + $0x54] ss:$8 sps:$4 sm:$0xff]   ;;  %v1376_v37 = vld [vmem:[#allocation2 + $0x1b0] ss:$8 sps:$4 sm:$0xff]   ;;  %v1377_v38 = vld [vmem:[#allocation2 + $0x1c4] ss:$8 sps:$4 sm:$0xff]  }
  0x1f   :  { %670 = vmatprep.subr.bf16.mxu1 %v1407_v25  ;;  %v1430_v39 = vld [vmem:[#allocation2 + $0x50] ss:$8 sps:$4 sm:$0xff]   ;;  %v1431_v40 = vld [vmem:[#allocation2 + $0x64] ss:$8 sps:$4 sm:$0xff]   ;;  %v1379_v41 = vld [vmem:[#allocation2 + $0x1c0] ss:$8 sps:$4 sm:$0xff]  }
  0x20   :  { %716 = vmatpush1.bf16.msra.mxu0 %v1352_v7  ;;  %v1380_v42 = vld [vmem:[#allocation2 + $0x1d4] ss:$8 sps:$4 sm:$0xff]   ;;  %v1436_v43 = vld [vmem:[#allocation2 + $0x60] ss:$8 sps:$4 sm:$0xff]   ;;  %v1382_v45 = vld [vmem:[#allocation2 + $0x1d0] ss:$8 sps:$4 sm:$0xff]  }
  0x21   :  { %717 = vmatprep.subr.bf16.mxu0 %v1353_v8  ;;  %v1437_v44 = vld [vmem:[#allocation2 + $0x74] ss:$8 sps:$4 sm:$0xff]   ;;  %v1383_v46 = vld [vmem:[#allocation2 + $0x1e4] ss:$8 sps:$4 sm:$0xff]   ;;  %v1442_v47 = vld [vmem:[#allocation2 + $0x70] ss:$8 sps:$4 sm:$0xff]  }
  0x22   :  { %671 = vmatpush1.bf16.msra.mxu1 %v1412_v27  ;;  %v1443_v48 = vld [vmem:[#allocation2 + $0x84] ss:$8 sps:$4 sm:$0xff]   ;;  %v1385_v49 = vld [vmem:[#allocation2 + $0x1e0] ss:$8 sps:$4 sm:$0xff]   ;;  %v1386_v50 = vld [vmem:[#allocation2 + $0x1f4] ss:$8 sps:$4 sm:$0xff]  }
  0x23   :  { %672 = vmatprep.subr.bf16.mxu1 %v1413_v28  ;;  %v1448_v51 = vld [vmem:[#allocation2 + $0x80] ss:$8 sps:$4 sm:$0xff]   ;;  %v1449_v52 = vld [vmem:[#allocation2 + $0x94] ss:$8 sps:$4 sm:$0xff]   ;;  %v1388_v53 = vld [vmem:[#allocation2 + $0x1f0] ss:$8 sps:$4 sm:$0xff]  }
  0x24   :  { %718 = vmatpush1.bf16.msra.mxu0 %v1355_v9  ;;  %v43_v54 = vld [vmem:[%s1723_s0 + $0x10] sm:$0xff]  ;;  %v50_v55 = vld [vmem:[%s1723_s0 + $0x48] sm:$0xff]  ;;  %v53_v62 = vld [vmem:[%s1723_s0 + $0x60] sm:$0xff]  ;;  %vm1135_vm2 = vcmask 80896  }
  0x25   :  { %719 = vmatprep.subr.bf16.mxu0 %v1356_v10  ;;  %v1391_v56 = vld [vmem:[#allocation2 + $0x204] ss:$8 sps:$4 sm:$0xff]   ;;  %v1454_v57 = vld [vmem:[#allocation2 + $0x90] ss:$8 sps:$4 sm:$0xff]   ;;  %v1389_v58 = vld [vmem:[#allocation2 + $0x200] ss:$8 sps:$4 sm:$0xff]   ;;  %v57_v59 = vpack.c.bf16 %v50_v55, %v43_v54 }
  0x26   :  { %673 = vmatpush1.bf16.msra.mxu1 %v1418_v31  ;;  %v1455_v60 = vld [vmem:[#allocation2 + $0xa4] ss:$8 sps:$4 sm:$0xff]   ;;  %v1394_v63 = vld [vmem:[#allocation2 + $0x214] ss:$8 sps:$4 sm:$0xff]   ;;  %v1460_v1 = vld [vmem:[#allocation2 + $0xa0] ss:$8 sps:$4 sm:$0xff]  }
  0x27   :  { %674 = vmatprep.subr.bf16.mxu1 %v1419_v32  ;;  %v46_v61 = vld [vmem:[%s1723_s0 + $0x28] sm:$0xff]  ;;  %v1461_v2 = vld [vmem:[#allocation2 + $0xb4] ss:$8 sps:$4 sm:$0xff]   ;;  %v1392_v3 = vld [vmem:[#allocation2 + $0x210] ss:$8 sps:$4 sm:$0xff]  }
  0x28   :  { %720 = vmatpush1.bf16.msra.mxu0 %v1358_v11  ;;  %v60_v0 = vpack.c.bf16 %v53_v62, %v46_v61  ;;  %v1399_v4 = vld [vmem:[#allocation2 + $0x224] ss:$8 sps:$4 sm:$0xff]   ;;  %v1466_v7 = vld [vmem:[#allocation2 + $0xb0] ss:$8 sps:$4 sm:$0xff]   ;;  %v1397_v10 = vld [vmem:[#allocation2 + $0x220] ss:$8 sps:$4 sm:$0xff]  }
  0x29   :  { %721 = vmatprep.subr.bf16.mxu0 %v1359_v12  ;;  %v42_v5 = vld [vmem:[%s1723_s0 + $0x8] sm:$0xff]  ;;  %v49_v6 = vld [vmem:[%s1723_s0 + $0x40] sm:$0xff]  ;;  %v1405_v11 = vld [vmem:[#allocation2 + $0x234] ss:$8 sps:$4 sm:$0xff]   ;;  %v1539_v61 = vmov 0  }
  0x2a   :  { %675 = vmatpush1.bf16.msra.mxu1 %v1424_v35  ;;  %v56_v8 = vpack.c.bf16 %v49_v6, %v42_v5  ;;  %v1467_v9 = vld [vmem:[#allocation2 + $0xc4] ss:$8 sps:$4 sm:$0xff]   ;;  %v1472_v12 = vld [vmem:[#allocation2 + $0xc0] ss:$8 sps:$4 sm:$0xff]   ;;  %v1473_v13 = vld [vmem:[#allocation2 + $0xd4] ss:$8 sps:$4 sm:$0xff]  }
  0x2b   :  { %676 = vmatprep.subr.bf16.mxu1 %v1425_v36  ;;  %v1403_v14 = vld [vmem:[#allocation2 + $0x230] ss:$8 sps:$4 sm:$0xff]   ;;  %v1411_v15 = vld [vmem:[#allocation2 + $0x244] ss:$8 sps:$4 sm:$0xff]   ;;  %v1417_v18 = vld [vmem:[#allocation2 + $0x254] ss:$8 sps:$4 sm:$0xff]  }
  0x2c   :  { %722 = vmatpush1.bf16.msra.mxu0 %v1361_v16  ;;  %698 = vmatprep.mubr.bf16.mxu1 %v56_v8  ;;  %v1409_v16 = vld [vmem:[#allocation2 + $0x240] ss:$8 sps:$4 sm:$0xff]   ;;  %v1485_v21 = vld [vmem:[#allocation2 + $0xf4] ss:$8 sps:$4 sm:$0xff]   ;;  %v1415_v22 = vld [vmem:[#allocation2 + $0x250] ss:$8 sps:$4 sm:$0xff]  }
  0x2d   :  { %723 = vmatprep.subr.bf16.mxu0 %v1362_v17  ;;  %v1478_v17 = vld [vmem:[#allocation2 + $0xd0] ss:$8 sps:$4 sm:$0xff]   ;;  %v41_v25 = vld [vmem:[%s1723_s0] sm:$0xff]  ;;  %v1490_v32 = vld [vmem:[%s1726_s3 + $0x48] sm:$0xff]   ;;  %v1540_v8 = vmov 0.0  }
  0x2e   :  { %677 = vmatpush1.bf16.msra.mxu1 %v1430_v39  ;;  %v1487_v24 = vld [vmem:[#allocation2 + $0xf0] ss:$8 sps:$4 sm:$0xff]   ;;  %v1488_v27 = vld [vmem:[%s1726_s3 + $0x40] sm:$0xff]   ;;  %v1491_v35 = vld [vmem:[%s1726_s3 + $0x8] sm:$0xff]  }
  0x2f   :  { %678 = vmatprep.subr.bf16.mxu1 %v1431_v40  ;;  %v1421_v28 = vld [vmem:[#allocation2 + $0x260] ss:$8 sps:$4 sm:$0xff]   ;;  %v1492_v36 = vld [vmem:[%s1726_s3 + $0x50] sm:$0xff]   ;;  %v1494_v40 = vld [vmem:[%s1726_s3 + $0x58] sm:$0xff]  }
  0x30   :  { %724 = vmatpush1.bf16.msra.mxu0 %v1364_v19  ;;  %v1479_v19 = vld [vmem:[#allocation2 + $0xe4] ss:$8 sps:$4 sm:$0xff]   ;;  %v1493_v39 = vld [vmem:[%s1726_s3 + $0x10] sm:$0xff]   ;;  %v1502_v6 = vld [vmem:[%s1726_s3 + $0x78] sm:$0xff]  }
  0x31   :  { %725 = vmatprep.subr.bf16.mxu0 %v1365_v20  ;;  %v1484_v20 = vld [vmem:[#allocation2 + $0xe0] ss:$8 sps:$4 sm:$0xff]   ;;  %v1477_v54 = vld [vmem:[#allocation2 + $0x2f4] ss:$8 sps:$4 sm:$0xff]   ;;  %v1475_v55 = vld [vmem:[#allocation2 + $0x2f0] ss:$8 sps:$4 sm:$0xff]  }
  0x32   :  { %679 = vmatpush1.bf16.msra.mxu1 %v1436_v43  ;;  %v1489_v31 = vld [vmem:[%s1726_s3] sm:$0xff]   ;;  %v1495_v43 = vld [vmem:[%s1726_s3 + $0x18] sm:$0xff]   ;;  %v47_v62 = vld [vmem:[%s1723_s0 + $0x30] sm:$0xff] }
  0x33   :  { %680 = vmatprep.subr.bf16.mxu1 %v1437_v44  ;;  %v1496_v44 = vld [vmem:[%s1726_s3 + $0x60] sm:$0xff]   ;;  %v1501_v5 = vld [vmem:[%s1726_s3 + $0x30] sm:$0xff]  }
  0x34   :  { %726 = vmatpush1.bf16.msra.mxu0 %v1367_v23  ;;  %v1423_v23 = vld [vmem:[#allocation2 + $0x264] ss:$8 sps:$4 sm:$0xff]  }
  0x35   :  { %727 = vmatprep.subr.bf16.mxu0 %v1368_v26  ;;  %v48_v26 = vld [vmem:[%s1723_s0 + $0x38] sm:$0xff] }
  0x36   :  { %681 = vmatpush1.bf16.msra.mxu1 %v1442_v47  ;;  %v1451_v47 = vld [vmem:[#allocation2 + $0x2b0] ss:$8 sps:$4 sm:$0xff]  }
  0x37   :  { %682 = vmatprep.subr.bf16.mxu1 %v1443_v48  ;;  %v1459_v48 = vld [vmem:[#allocation2 + $0x2c4] ss:$8 sps:$4 sm:$0xff]  }
  0x38   :  { %728 = vmatpush1.bf16.msra.mxu0 %v1370_v29  ;;  %v1429_v29 = vld [vmem:[#allocation2 + $0x274] ss:$8 sps:$4 sm:$0xff]  }
  0x39   :  { %729 = vmatprep.subr.bf16.mxu0 %v1371_v30  ;;  %v55_v30 = vpack.c.bf16 %v48_v26, %v41_v25 }
  0x3a   :  { %683 = vmatpush1.bf16.msra.mxu1 %v1448_v51  ;;  %v1463_v51 = vld [vmem:[#allocation2 + $0x2d0] ss:$8 sps:$4 sm:$0xff]  }
  0x3b   :  { %684 = vmatprep.subr.bf16.mxu1 %v1449_v52  ;;  %v1471_v52 = vld [vmem:[#allocation2 + $0x2e4] ss:$8 sps:$4 sm:$0xff]  }
  0x3c   :  { %730 = vmatpush1.bf16.msra.mxu0 %v1373_v33  ;;  %v1427_v33 = vld [vmem:[#allocation2 + $0x270] ss:$8 sps:$4 sm:$0xff]  }
  0x3d   :  { %731 = vmatprep.subr.bf16.mxu0 %v1374_v34  ;;  %v1435_v34 = vld [vmem:[#allocation2 + $0x284] ss:$8 sps:$4 sm:$0xff]  }
  0x3e   :  { %685 = vmatpush1.bf16.msra.mxu1 %v1454_v57  ;;  %v52_v57 = vld [vmem:[%s1723_s0 + $0x58] sm:$0xff] }
  0x3f   :  { %686 = vmatprep.subr.bf16.mxu1 %v1455_v60  ;;  %v1481_v60 = vld [vmem:[#allocation2 + $0x300] ss:$8 sps:$4 sm:$0xff]  }
  0x40   :  { %732 = vmatpush1.bf16.msra.mxu0 %v1376_v37  ;;  %v1433_v37 = vld [vmem:[#allocation2 + $0x280] ss:$8 sps:$4 sm:$0xff]  }
  0x41   :  { %733 = vmatprep.subr.bf16.mxu0 %v1377_v38  ;;  %v1441_v38 = vld [vmem:[#allocation2 + $0x294] ss:$8 sps:$4 sm:$0xff]  }
  0x42   :  { %687 = vmatpush1.bf16.msra.mxu1 %v1460_v1  ;;  %v1497_v1 = vld [vmem:[%s1726_s3 + $0x20] sm:$0xff]  }
  0x43   :  { %688 = vmatprep.subr.bf16.mxu1 %v1461_v2  ;;  %v1498_v2 = vld [vmem:[%s1726_s3 + $0x68] sm:$0xff]  }
  0x44   :  { %734 = vmatpush1.bf16.msra.mxu0 %v1379_v41  ;;  %v1439_v41 = vld [vmem:[#allocation2 + $0x290] ss:$8 sps:$4 sm:$0xff]  }
  0x45   :  { %735 = vmatprep.subr.bf16.mxu0 %v1380_v42  ;;  %v1447_v42 = vld [vmem:[#allocation2 + $0x2a4] ss:$8 sps:$4 sm:$0xff]  }
  0x46   :  { %689 = vmatpush1.bf16.msra.mxu1 %v1466_v7  ;;  %v1503_v7 = vld [vmem:[%s1726_s3 + $0x38] sm:$0xff]  }
  0x47   :  { %690 = vmatprep.subr.bf16.mxu1 %v1467_v9 }
  0x48   :  { %736 = vmatpush1.bf16.msra.mxu0 %v1382_v45  ;;  %v1445_v45 = vld [vmem:[#allocation2 + $0x2a0] ss:$8 sps:$4 sm:$0xff]  }
  0x49   :  { %737 = vmatprep.subr.bf16.mxu0 %v1383_v46  ;;  %v1453_v46 = vld [vmem:[#allocation2 + $0x2b4] ss:$8 sps:$4 sm:$0xff]  }
  0x4a   :  { %691 = vmatpush1.bf16.msra.mxu1 %v1472_v12 }
  0x4b   :  { %692 = vmatprep.subr.bf16.mxu1 %v1473_v13  ;;  %v162_v13 = vlaneseq }
  0x4c   :  { %738 = vmatpush1.bf16.msra.mxu0 %v1385_v49  ;;  %v1457_v49 = vld [vmem:[#allocation2 + $0x2c0] ss:$8 sps:$4 sm:$0xff]  }
  0x4d   :  { %739 = vmatprep.subr.bf16.mxu0 %v1386_v50  ;;  %v1465_v50 = vld [vmem:[#allocation2 + $0x2d4] ss:$8 sps:$4 sm:$0xff]  }
  0x4e   :  { %693 = vmatpush1.bf16.msra.mxu1 %v1478_v17 }
  0x4f   :  { %694 = vmatprep.subr.bf16.mxu1 %v1479_v19 }
  0x50   :  { %740 = vmatpush1.bf16.msra.mxu0 %v1388_v53  ;;  %v1469_v53 = vld [vmem:[#allocation2 + $0x2e0] ss:$8 sps:$4 sm:$0xff]  }
  0x51   :  { %752 = vmatprep.subr.bf16.mxu0 %v1391_v56  ;;  %v45_v56 = vld [vmem:[%s1723_s0 + $0x20] sm:$0xff] }
  0x52   :  { %695 = vmatpush1.bf16.msra.mxu1 %v1484_v20 }
  0x53   :  { %742 = vmatmul.mubr.bf16.vlgmr.msra.gmra.mrb[0].mxu0 %v57_v59  ;;  %696 = vmatprep.subr.bf16.mxu1 %v1485_v21  ;;  %v59_v59 = vpack.c.bf16 %v52_v57, %v45_v56 }
  0x54   :  { %753 = vmatpush1.bf16.msra.mxu0 %v1389_v58  ;;  %784 = vmatprep.mubr.bf16.mxu0 %v60_v0  ;;  %v1483_v58 = vld [vmem:[#allocation2 + $0x304] ss:$8 sps:$4 sm:$0xff]  }
  0x55   :  { %754 = vmatprep.subr.bf16.mxu0 %v1394_v63  ;;  %v54_v63 = vld [vmem:[%s1723_s0 + $0x68] sm:$0xff] }
  0x56   :  { %697 = vmatpush1.bf16.msra.mxu1 %v1487_v24  ;;  %v61_v0 = vpack.c.bf16 %v54_v63, %v47_v62 }
  0x57   :  { %1268 = vmatprep.subr.bf16.mxu1 %v1488_v27 }
  0x58   :  { %755 = vmatpush1.bf16.msra.mxu0 %v1392_v3  ;;  %v1499_v3 = vld [vmem:[%s1726_s3 + $0x28] sm:$0xff]  }
  0x59   :  { %756 = vmatprep.subr.bf16.mxu0 %v1399_v4  ;;  %699 = vmatmul.mubr.bf16.vlgmr.msra.gmra.mrb[0].mxu1 %v55_v30  ;;  %v1500_v4 = vld [vmem:[%s1726_s3 + $0x70] sm:$0xff]  }
  0x5a   :  { %1269 = vmatpush3.bf16.msra.mxu1 %v1489_v31 }
  0x5b   :  { %1270 = vmatprep.subr.bf16.mxu1 %v1490_v32 }
  0x5c   :  { %757 = vmatpush1.bf16.msra.mxu0 %v1397_v10 }
  0x5d   :  { %758 = vmatprep.subr.bf16.mxu0 %v1405_v11 }
  0x5e   :  { %1271 = vmatpush3.bf16.msra.mxu1 %v1491_v35 }
  0x5f   :  { %1272 = vmatprep.subr.bf16.mxu1 %v1492_v36 }
  0x60   :  { %759 = vmatpush1.bf16.msra.mxu0 %v1403_v14  ;;  %v163_v14 = vshrl.u32 %v162_v13, 7 }
  0x61   :  { %760 = vmatprep.subr.bf16.mxu0 %v1411_v15 }
  0x62   :  { %1273 = vmatpush3.bf16.msra.mxu1 %v1493_v39  ;;  %v164_v15 = vsub.s32 0, %v163_v14  ;;  %v168_v17 = vsub.s32 1, %v163_v14  ;;  %v1505_v39 = vld [vmem:[%s1728_s5 + $0x8] sm:$0xff]  }
  0x63   :  { %1274 = vmatprep.subr.bf16.mxu1 %v1494_v40  ;;  %v1506_v40 = vld [vmem:[%s1728_s5 + $0x10] sm:$0xff]  }
  0x64   :  { %761 = vmatpush1.bf16.msra.mxu0 %v1409_v16  ;;  %v160_v16 = vld [vmem:[%s1725_s2] sm:$0x3] }
  0x65   :  { %762 = vmatprep.subr.bf16.mxu0 %v1417_v18  ;;  %v165_v18 = vrot.slane %v160_v16, %v164_v15  ;;  %v169_v19 = vrot.slane %v160_v16, %v168_v17 }
  0x66   :  { %1275 = vmatpush3.bf16.msra.mxu1 %v1495_v43  ;;  %v1509_v43 = vld [vmem:[%s1728_s5 + $0x28] sm:$0xff]  }
  0x67   :  { %1276 = vmatprep.subr.bf16.mxu1 %v1496_v44  ;;  %v1510_v44 = vld [vmem:[%s1728_s5 + $0x30] sm:$0xff]  }
  0x68   :  { %763 = vmatpush1.bf16.msra.mxu0 %v1415_v22 }
  0x69   :  { %764 = vmatprep.subr.bf16.mxu0 %v1423_v23 }
  0x6a   :  { %1277 = vmatpush3.bf16.msra.mxu1 %v1497_v1 }
  0x6b   :  { %1278 = vmatprep.subr.bf16.mxu1 %v1498_v2 }
  0x6c   :  { %765 = vmatpush1.bf16.msra.mxu0 %v1421_v28 }
  0x6d   :  { %766 = vmatprep.subr.bf16.mxu0 %v1429_v29 }
  0x6e   :  { %1279 = vmatpush3.bf16.msra.mxu1 %v1499_v3 }
  0x6f   :  { %1280 = vmatprep.subr.bf16.mxu1 %v1500_v4 }
  0x70   :  { %767 = vmatpush1.bf16.msra.mxu0 %v1427_v33 }
  0x71   :  { %768 = vmatprep.subr.bf16.mxu0 %v1435_v34 }
  0x72   :  { %1281 = vmatpush3.bf16.msra.mxu1 %v1501_v5 }
  0x73   :  { %1282 = vmatprep.subr.bf16.mxu1 %v1502_v6 }
  0x74   :  { %769 = vmatpush1.bf16.msra.mxu0 %v1433_v37 }
  0x75   :  { %770 = vmatprep.subr.bf16.mxu0 %v1441_v38  ;;  %v1504_v38 = vld [vmem:[%s1728_s5] sm:$0xff]  }
  0x76   :  { %1283 = vmatpush3.bf16.msra.mxu1 %v1503_v7 }
  0x77   :  { %1299 = vmatprep.subr.bf16.mxu1 %v1540_v8 }
  0x78   :  { %771 = vmatpush1.bf16.msra.mxu0 %v1439_v41  ;;  %v1507_v41 = vld [vmem:[%s1728_s5 + $0x18] sm:$0xff]  }
  0x79   :  { %772 = vmatprep.subr.bf16.mxu0 %v1447_v42  ;;  %v1508_v42 = vld [vmem:[%s1728_s5 + $0x20] sm:$0xff]  }
  0x7c   :  { %773 = vmatpush1.bf16.msra.mxu0 %v1445_v45  ;;  %v1511_v45 = vld [vmem:[%s1728_s5 + $0x38] sm:$0xff]  }
  0x7d   :  { %774 = vmatprep.subr.bf16.mxu0 %v1453_v46 }
  0x80   :  { %775 = vmatpush1.bf16.msra.mxu0 %v1451_v47  ;;  %v1242_v47 = vld [vmem:[%s1727_s4] ss:$0 sm:$0xff] }
  0x81   :  { %776 = vmatprep.subr.bf16.mxu0 %v1459_v48 }
  0x84   :  { %777 = vmatpush1.bf16.msra.mxu0 %v1457_v49 }
  0x85   :  { %778 = vmatprep.subr.bf16.mxu0 %v1465_v50 }
  0x88   :  { %779 = vmatpush1.bf16.msra.mxu0 %v1463_v51 }
  0x89   :  { %780 = vmatprep.subr.bf16.mxu0 %v1471_v52 }
  0x8c   :  { %781 = vmatpush1.bf16.msra.mxu0 %v1469_v53 }
  0x8d   :  { %782 = vmatprep.subr.bf16.mxu0 %v1477_v54 }
  0x90   :  { %783 = vmatpush1.bf16.msra.mxu0 %v1475_v55 }
  0x91   :  { %795 = vmatprep.subr.bf16.mxu0 %v1483_v58  ;;  %v1259_v58 = vld [vmem:[%s1729_s6] ss:$0 sm:$0xff] }
  0x93   :  { %785 = vmatmul.mubr.bf16.vlgmr.msra.gmra.mrb[0].mxu0 %v59_v59 }
  0x94   :  { %796 = vmatpush1.bf16.msra.mxu0 %v1481_v60  ;;  %827 = vmatprep.mubr.bf16.mxu0 %v1539_v61 }
  0x9f   :  { %1241 = vmatmul.mubr.msk.bf16.vlgmr.msra.gmra.mrb[0].mxu0 %vm662_vm0, %v61_v0 }
 0x12c   :  { %v700_v9 = vpop.f32.mrb[0].mxu1 }
 0x12d   :  { %v702_v10 = vpop.f32.mrb[1].mxu1  ;;  %v701_v20 = vadd.f32 %v700_v9, %v165_v18 }
 0x12e   :  { %v704_v11 = vpop.f32.mrb[2].mxu1  ;;  %v703_v21 = vadd.f32 %v702_v10, %v169_v19 }
 0x12f   :  { %v706_v12 = vpop.f32.mrb[3].mxu1  ;;  %v705_v23 = vadd.f32 %v704_v11, %v165_v18 }
 0x130   :  { %v707_v26 = vadd.f32 %v706_v12, %v169_v19 }
 0x172   :  { %v829_v22 = vpop.f32.mrb[0].mxu0 }
 0x173   :  { %v1320_v24 = vadd.f32 %v829_v22, %v701_v20  ;;  %v831_v25 = vpop.f32.mrb[1].mxu0 }
 0x174   :  { %v1322_v27 = vadd.f32 %v831_v25, %v703_v21  ;;  %v833_v28 = vpop.f32.mrb[2].mxu0 }
 0x175   :  { %v1324_v29 = vadd.f32 %v833_v28, %v705_v23  ;;  %v835_v30 = vpop.f32.mrb[3].mxu0  ;;  %v838_v32 = vmax.f32 %v1320_v24, 0.0 }
 0x176   :  { %v1326_v31 = vadd.f32 %v835_v30, %v707_v26  ;;  %v839_v34 = vmax.f32 %v1322_v27, 0.0 }
 0x177   :  { %v840_v33 = vmax.f32 %v1324_v29, 0.0 }
 0x178   :  { %v841_v35 = vmax.f32 %v1326_v31, 0.0 }
 0x179   :  { %v842_v36 = vpack.c.bf16 %v840_v33, %v838_v32 }
 0x17a   :  { %v843_v37 = vpack.c.bf16 %v841_v35, %v839_v34 }
 0x17c   :  { %1011 = vmatprep.mubr.bf16.mxu1 %v843_v37 }
 0x17d   :  { %1012 = vmatmul.mubr.bf16.vlgmr.msra.gmra.mrb[4].mxu1 %v842_v36 }
 0x17e   :  { %1300 = vmatpush3.bf16.msra.mxu1 %v1504_v38  ;;  %1315 = vmatprep.mubr.msk.bf16.mxu1 %vm1541_vm1, %v1540_v8 }
 0x17f   :  { %1301 = vmatprep.subr.bf16.mxu1 %v1540_v8 }
 0x182   :  { %1302 = vmatpush3.bf16.msra.mxu1 %v1505_v39 }
 0x183   :  { %1303 = vmatprep.subr.bf16.mxu1 %v1540_v8 }
 0x186   :  { %1304 = vmatpush3.bf16.msra.mxu1 %v1506_v40 }
 0x187   :  { %1305 = vmatprep.subr.bf16.mxu1 %v1540_v8 }
 0x18a   :  { %1306 = vmatpush3.bf16.msra.mxu1 %v1507_v41 }
 0x18b   :  { %1307 = vmatprep.subr.bf16.mxu1 %v1540_v8 }
 0x18e   :  { %1308 = vmatpush3.bf16.msra.mxu1 %v1508_v42 }
 0x18f   :  { %1309 = vmatprep.subr.bf16.mxu1 %v1540_v8 }
 0x192   :  { %1310 = vmatpush3.bf16.msra.mxu1 %v1509_v43 }
 0x193   :  { %1311 = vmatprep.subr.bf16.mxu1 %v1540_v8 }
 0x196   :  { %1312 = vmatpush3.bf16.msra.mxu1 %v1510_v44 }
 0x197   :  { %1313 = vmatprep.subr.bf16.mxu1 %v1540_v8 }
 0x19a   :  { %1314 = vmatpush3.bf16.msra.mxu1 %v1511_v45 }
 0x250   :  { %v1284_v46 = vpop.f32.mrb[4].mxu1 }
 0x251   :  { %v1285_v48 = vpop.f32.mrb[5].mxu1 }
 0x252   :  { %v1286_v49 = vadd.f32 %v1285_v48, %v1284_v46  ;;  %v1287_v50 = vpop.f32.mrb[6].mxu1 }
 0x253   :  { %v1288_v51 = vpop.f32.mrb[7].mxu1 }
 0x254   :  { %v1014_v52 = vadd.f32 %v1286_v49, %v1242_v47  ;;  %v1289_v53 = vadd.f32 %v1288_v51, %v1287_v50 }
 0x256   :  { %v1017_v54 = vadd.f32 %v1289_v53, %v1242_v47  ;;  %v1020_v55 = vmax.f32 %v1014_v52, 0.0 }
 0x258   :  { %v1021_v56 = vmax.f32 %v1017_v54, 0.0 }
 0x25a   :  { %v1022_v57 = vpack.c.bf16 %v1021_v56, %v1020_v55 }
 0x25c   :  { %1316 = vmatmul.mubr.bf16.vlgmr.msra.gmra.mrb[8].mxu1 %v1022_v57 }
 0x32f   :  { %v1128_v59 = vpop.f32.mrb[8].mxu1 }
 0x330   :  { %v1129_v60 = vadd.f32 %v1259_v58, %v1128_v59  ;;  %v1317_v61 = vpop.f32.mrb[9].mxu1 }
 0x331   :  { %v1131_v62 = vpop.f32.mrb[10].mxu1 }
 0x332   :  { %1136 = vst.msk [vmem:[%s1730_s7] sm:$0xff] %vm1135_vm2, %v1129_v60  ;;  %v1132_v63 = vadd.f32 %v1259_v58, %v1131_v62  ;;  %v1318_v0 = vpop.f32.mrb[11].mxu1 }
 0x334   :  { %1137 = vst.msk [vmem:[%s1730_s7 + $0x8] sm:$0xff] %vm1135_vm2, %v1132_v63 }
 0x335   :  { %1142 = vsyncpa [#allocation3], 1 }

</bundles_post_ra>
